<compile_context>
chip_gen: v5e
topology: v5e:2x2
jax: 0.10.0
libtpu: 0.0.40
codegen_flags: <defaults>
</compile_context>

<pallas_src>
import functools

import jax
import jax.numpy as jnp
from jax.experimental import pallas as pl
from jax.experimental.pallas import tpu as pltpu


def _round_up(x, m):
    return (x + m - 1) // m * m


def _cdiv(a, b):
    return -(-a // b)


def _vmem_limit_bytes():
    """Generation-aware scoped-VMEM limit (leaves headroom for Mosaic internals)."""
    try:
        cap = int(pltpu.get_tpu_info().vmem_capacity_bytes)
    except Exception:
        cap = 64 * 1024 * 1024  # conservative (v7x per-TensorCore physical VMEM)
    # ~100 MiB usable on 128 MiB gens (v5e/v6e); ~52 MiB on v7x's 64 MiB.
    return int(min(cap - 12 * 1024 * 1024, 100 * 1024 * 1024))


def _choose_tiles(B, C, HW, x_itemsize, Fp, Np, tile_b, vmem_budget):
    """Pick (TB, Bp, hw_tile, HWp) so all live VMEM fits the per-generation budget."""
    LANE, SUB = 128, 8
    Cp = _round_up(C, SUB)  # sublane-padded channel count (VMEM layout)

    # Resident weights/biases (assume double-buffered by the pipeline; f32).
    w_bytes = 2 * 4 * (C * Fp + Fp + Fp * Np + Np)

    # HW tiling: keep streamed blocks near the bandwidth sweet spot, bound padding.
    HW128 = _round_up(HW, LANE)
    max_hw_tile = 2048
    n_hw = max(1, _cdiv(HW128, max_hw_tile))
    hw_tile = _round_up(_cdiv(HW128, n_hw), LANE)
    HWp = n_hw * hw_tile

    def fits(tb):
        x_blk = tb * Cp * hw_tile * x_itemsize        # one streamed x buffer
        sum_tmp = tb * Cp * hw_tile * 4               # worst-case f32 temp for the reduce
        out_blk = 2 * tb * Np * 4                     # double-buffered output
        gap_acc = tb * max(C, LANE) * 4               # lane-padded accumulator
        mm_tmp = tb * (Fp + Np) * 4                   # matmul temporaries
        total = w_bytes + 2 * x_blk + sum_tmp + out_blk + gap_acc + mm_tmp
        return total <= vmem_budget

    tb = _round_up(min(tile_b, _round_up(B, SUB)), SUB)
    while tb > SUB and not fits(tb):
        tb -= SUB

    # Bound batch-padding waste and (when B allows) give the v7x megacore >= 2 tiles.
    n_b = _cdiv(B, tb)
    if B > SUB and n_b < 2:
        n_b = 2
    tb = _round_up(_cdiv(B, n_b), SUB)
    Bp = n_b * tb
    return tb, Bp, hw_tile, HWp, n_hw, n_b


def _model_kernel(x_ref, wp_ref, bp_ref, wh_ref, bh_ref, out_ref, gap_acc, *, inv_hw):
    # grid = (batch tiles, HW tiles); HW axis is the reduction ("arbitrary") axis.
    hw_i = pl.program_id(1)

    @pl.when(hw_i == 0)
    def _init():
        gap_acc[...] = jnp.zeros_like(gap_acc)

    # Partial GAP over this HW tile; accumulate in f32 without materializing a
    # full-tile f32 copy of the streamed (possibly bf16) x block.
    gap_acc[...] += jnp.sum(x_ref[...], axis=-1, dtype=jnp.float32)

    @pl.when(hw_i == pl.num_programs(1) - 1)
    def _finish():
        gap = gap_acc[...] * inv_hw                                   # [TB, C]
        # "backbone" projection to padded feature dim Fp + ReLU  -> [TB, Fp]
        feat = jnp.dot(gap, wp_ref[...], preferred_element_type=jnp.float32) + bp_ref[...]
        feat = jnp.maximum(feat, 0.0)
        # classification head: Linear(Fp -> Np) -> [TB, Np]  (lane-dense, unmasked store)
        out = jnp.dot(feat, wh_ref[...], preferred_element_type=jnp.float32) + bh_ref[...]
        out_ref[...] = out.astype(out_ref.dtype)


def model_forward(x_nchw, wp, bp, wh, bh, *, tile_b=128, stream_dtype=jnp.bfloat16):
    """x_nchw: [B, C, H, W]. wp: [C, F], bp: [1, F], wh: [F, catNums], bh: [1, catNums].

    Returns [B, catNums] float32. By default x is streamed as bf16 (halves HBM traffic
    on this bandwidth-bound kernel); the kernel accumulates in f32 either way. Pass
    stream_dtype=jnp.float32 (or None) for bit-exact f32 streaming.
    """
    B, C, H, W = x_nchw.shape
    HW = H * W
    assert wp.shape[0] == C
    F = wp.shape[1]
    catNums = wh.shape[1]

    LANE = 128
    Fp = _round_up(F, LANE)
    Np = _round_up(catNums, LANE)

    # ---- glue (plain JAX): flatten spatial, cast stream dtype, pad dims ----
    x_flat = x_nchw.reshape(B, C, HW)
    if stream_dtype is not None:
        x_flat = x_flat.astype(stream_dtype)
    x_itemsize = jnp.dtype(x_flat.dtype).itemsize

    vmem_limit = _vmem_limit_bytes()
    TB, Bp, hw_tile, HWp, n_hw, n_b = _choose_tiles(
        B, C, HW, x_itemsize, Fp, Np, tile_b, int(vmem_limit * 0.9)
    )

    if Bp != B or HWp != HW:
        x_flat = jnp.pad(x_flat, ((0, Bp - B), (0, 0), (0, HWp - HW)))
    wp_p = jnp.pad(wp, ((0, 0), (0, Fp - F)))
    bp_p = jnp.pad(bp.reshape(1, F), ((0, 0), (0, Fp - F)))
    wh_p = jnp.pad(wh, ((0, Fp - F), (0, Np - catNums)))
    bh_p = jnp.pad(bh.reshape(1, catNums), ((0, 0), (0, Np - catNums)))

    grid = (n_b, n_hw)

    bytes_accessed = int(
        Bp * C * HWp * x_itemsize                 # dominant: streaming x
        + (C * Fp + Fp + Fp * Np + Np) * 4        # resident weights/biases
        + Bp * Np * 4                             # output writeback
    )
    flops = int(Bp * C * HWp + 2 * Bp * C * Fp + 2 * Bp * Fp * Np)
    cost = pl.CostEstimate(flops=flops, transcendentals=0, bytes_accessed=bytes_accessed)

    kernel = functools.partial(_model_kernel, inv_hw=1.0 / HW)

    out_padded = pl.pallas_call(
        kernel,
        out_shape=jax.ShapeDtypeStruct((Bp, Np), jnp.float32),
        grid=grid,
        in_specs=[
            # streamed per (batch tile, HW tile); double-buffered by the pipeline.
            # (If profiling shows exposed DMA, bump to pipeline_mode=pl.Buffered(3)
            #  together with a smaller block budget.)
            pl.BlockSpec((TB, C, hw_tile), lambda i, j: (i, 0, j)),
            pl.BlockSpec((C, Fp), lambda i, j: (0, 0)),   # resident in VMEM
            pl.BlockSpec((1, Fp), lambda i, j: (0, 0)),
            pl.BlockSpec((Fp, Np), lambda i, j: (0, 0)),
            pl.BlockSpec((1, Np), lambda i, j: (0, 0)),
        ],
        out_specs=pl.BlockSpec((TB, Np), lambda i, j: (i, 0)),
        scratch_shapes=[pltpu.VMEM((TB, C), jnp.float32)],  # GAP accumulator
        compiler_params=pltpu.CompilerParams(
            # batch tiles shard across TensorCores (v7x); HW axis is the reduction.
            dimension_semantics=("parallel", "arbitrary"),
            vmem_limit_bytes=vmem_limit,
        ),
        cost_estimate=cost,
    )(x_flat, wp_p, bp_p, wh_p, bh_p)

    # glue: strip batch / class padding
    return out_padded[:B, :catNums]


if __name__ == "__main__":
    # Small shapes consistent with the forward: batch=2, channels=4, spatial=16,
    # synthetic backbone feature dim=32, catNums=10.
    B, C, H, W = 2, 4, 16, 16
    F = 32
    catNums = 10

    key = jax.random.PRNGKey(0)
    kx, kwp, kwh = jax.random.split(key, 3)

    x = jax.random.normal(kx, (B, C, H, W), dtype=jnp.float32)

    # synthetic backbone projection weights (deterministic)
    wp = jax.random.normal(kwp, (C, F), dtype=jnp.float32) * 0.1
    bp = jnp.zeros((1, F), dtype=jnp.float32)

    # head: normalInit(mean=0, stddev=0.01), bias zero
    wh = jax.random.normal(kwh, (F, catNums), dtype=jnp.float32) * 0.01
    bh = jnp.zeros((1, catNums), dtype=jnp.float32)

    # reference in plain JAX (f32)
    gap_ref = jnp.mean(x.reshape(B, C, H * W), axis=-1)
    feat_ref = jnp.maximum(gap_ref @ wp + bp, 0.0)
    out_ref = feat_ref @ wh + bh

    # exact-precision path (f32 streaming)
    out_f32 = model_forward(x, wp, bp, wh, bh, stream_dtype=jnp.float32)
    jax.block_until_ready(out_f32)
    assert out_f32.shape == (B, catNums)
    assert jnp.allclose(out_f32, out_ref, atol=1e-5), "f32 path mismatch vs reference"

    # default fast path (bf16 streaming of x, f32 accumulation in-kernel)
    out_fast = model_forward(x, wp, bp, wh, bh)
    jax.block_until_ready(out_fast)
    assert out_fast.shape == (B, catNums)
    assert jnp.allclose(out_fast, out_ref, atol=5e-3, rtol=5e-2), "bf16 path mismatch"

    print("KERNEL_OK")
</pallas_src>

<mosaic_0001>
module attributes {stable_mosaic.version = 11 : i64} {
  func.func @_model_kernel(%arg0: i32, %arg1: i32, %arg2: memref<8x4x256xf32, #tpu.memory_space<vmem>>, %arg3: memref<4x128xf32, #tpu.memory_space<vmem>>, %arg4: memref<1x128xf32, #tpu.memory_space<vmem>>, %arg5: memref<128x128xf32, #tpu.memory_space<vmem>>, %arg6: memref<1x128xf32, #tpu.memory_space<vmem>>, %arg7: memref<8x128xf32, #tpu.memory_space<vmem>>, %arg8: memref<8x4xf32, #tpu.memory_space<vmem>>) attributes {dimension_semantics = [#tpu.dimension_semantics<parallel>, #tpu.dimension_semantics<arbitrary>], iteration_bounds = array<i64: 1, 1>, scalar_prefetch = 0 : i64, scratch_operands = 1 : i64, tpu.core_type = #tpu.core_type<tc>, window_params = [{transform_indices = @transform_0, window_bounds = array<i64: 8, 4, 256>}, {pipeline_mode = #tpu.pipeline_mode<synchronous>, transform_indices = @transform_1, window_bounds = array<i64: 4, 128>}, {pipeline_mode = #tpu.pipeline_mode<synchronous>, transform_indices = @transform_2, window_bounds = array<i64: 1, 128>}, {pipeline_mode = #tpu.pipeline_mode<synchronous>, transform_indices = @transform_3, window_bounds = array<i64: 128, 128>}, {pipeline_mode = #tpu.pipeline_mode<synchronous>, transform_indices = @transform_4, window_bounds = array<i64: 1, 128>}, {transform_indices = @transform_5, window_bounds = array<i64: 8, 128>}]} {
    %c0_i32 = arith.constant 0 : i32
    %0 = arith.cmpi eq, %arg1, %c0_i32 : i32
    %1 = arith.extui %0 : i1 to i32
    %c0_i32_0 = arith.constant 0 : i32
    %2 = arith.cmpi ne, %1, %c0_i32_0 : i32
    scf.if %2 {
      %cst_9 = arith.constant 0.000000e+00 : f32
      %11 = vector.broadcast %cst_9 : f32 to vector<8x4xf32>
      %c0_10 = arith.constant 0 : index
      %c0_11 = arith.constant 0 : index
      %12 = vector.load %arg8[%c0_10, %c0_11] : memref<8x4xf32, #tpu.memory_space<vmem>>, vector<8x4xf32>
      tpu.vector_store %arg8[%c0_10, %c0_11], %11 {strides = array<i32>} : memref<8x4xf32, #tpu.memory_space<vmem>>, vector<8x4xf32>,
    } else {
    }
    %c0 = arith.constant 0 : index
    %c0_1 = arith.constant 0 : index
    %3 = vector.load %arg8[%c0, %c0_1] : memref<8x4xf32, #tpu.memory_space<vmem>>, vector<8x4xf32>
    %c0_2 = arith.constant 0 : index
    %c0_3 = arith.constant 0 : index
    %c0_4 = arith.constant 0 : index
    %4 = vector.load %arg2[%c0_2, %c0_3, %c0_4] : memref<8x4x256xf32, #tpu.memory_space<vmem>>, vector<8x4x256xf32>
    %cst = arith.constant dense<0.000000e+00> : vector<8x4xf32>
    %5 = vector.multi_reduction <add>, %4, %cst [2] : vector<8x4x256xf32> to vector<8x4xf32>
    %6 = arith.addf %3, %5 : vector<8x4xf32>
    %c0_5 = arith.constant 0 : index
    %c0_6 = arith.constant 0 : index
    %7 = vector.load %arg8[%c0_5, %c0_6] : memref<8x4xf32, #tpu.memory_space<vmem>>, vector<8x4xf32>
    tpu.vector_store %arg8[%c0_5, %c0_6], %6 {strides = array<i32>} : memref<8x4xf32, #tpu.memory_space<vmem>>, vector<8x4xf32>,
    %c0_i32_7 = arith.constant 0 : i32
    %8 = arith.cmpi eq, %arg1, %c0_i32_7 : i32
    %9 = arith.extui %8 : i1 to i32
    %c0_i32_8 = arith.constant 0 : i32
    %10 = arith.cmpi ne, %9, %c0_i32_8 : i32
    scf.if %10 {
      %c0_9 = arith.constant 0 : index
      %c0_10 = arith.constant 0 : index
      %11 = vector.load %arg8[%c0_9, %c0_10] : memref<8x4xf32, #tpu.memory_space<vmem>>, vector<8x4xf32>
      %cst_11 = arith.constant 3.906250e-03 : f32
      %12 = vector.broadcast %cst_11 : f32 to vector<8x4xf32>
      %13 = arith.mulf %11, %12 : vector<8x4xf32>
      %c0_12 = arith.constant 0 : index
      %c0_13 = arith.constant 0 : index
      %14 = vector.load %arg3[%c0_12, %c0_13] : memref<4x128xf32, #tpu.memory_space<vmem>>, vector<4x128xf32>
      %cst_14 = arith.constant dense<0.000000e+00> : vector<8x128xf32>
      %15 = tpu.matmul %13, %14, %cst_14 {dimension_numbers = #tpu.dot_dimension_numbers<[1], [0], [0], [1], [0, 0, 1, 1], [], []>} : vector<8x4xf32>, vector<4x128xf32>, vector<8x128xf32> -> vector<8x128xf32>
      %c0_15 = arith.constant 0 : index
      %c0_16 = arith.constant 0 : index
      %16 = vector.load %arg4[%c0_15, %c0_16] : memref<1x128xf32, #tpu.memory_space<vmem>>, vector<1x128xf32>
      %17 = vector.broadcast %16 : vector<1x128xf32> to vector<8x128xf32>
      %18 = arith.addf %15, %17 : vector<8x128xf32>
      %cst_17 = arith.constant 0.000000e+00 : f32
      %19 = vector.broadcast %cst_17 : f32 to vector<8x128xf32>
      %20 = arith.maximumf %18, %19 : vector<8x128xf32>
      %c0_18 = arith.constant 0 : index
      %c0_19 = arith.constant 0 : index
      %21 = vector.load %arg5[%c0_18, %c0_19] : memref<128x128xf32, #tpu.memory_space<vmem>>, vector<128x128xf32>
      %cst_20 = arith.constant dense<0.000000e+00> : vector<8x128xf32>
      %22 = tpu.matmul %20, %21, %cst_20 {dimension_numbers = #tpu.dot_dimension_numbers<[1], [0], [0], [1], [0, 0, 1, 1], [], []>} : vector<8x128xf32>, vector<128x128xf32>, vector<8x128xf32> -> vector<8x128xf32>
      %c0_21 = arith.constant 0 : index
      %c0_22 = arith.constant 0 : index
      %23 = vector.load %arg6[%c0_21, %c0_22] : memref<1x128xf32, #tpu.memory_space<vmem>>, vector<1x128xf32>
      %24 = vector.broadcast %23 : vector<1x128xf32> to vector<8x128xf32>
      %25 = arith.addf %22, %24 : vector<8x128xf32>
      %c0_23 = arith.constant 0 : index
      %c0_24 = arith.constant 0 : index
      %26 = vector.load %arg7[%c0_23, %c0_24] : memref<8x128xf32, #tpu.memory_space<vmem>>, vector<8x128xf32>
      tpu.vector_store %arg7[%c0_23, %c0_24], %25 {strides = array<i32>} : memref<8x128xf32, #tpu.memory_space<vmem>>, vector<8x128xf32>,
    } else {
    }
    return
  }
  func.func @transform_0(%arg0: i32, %arg1: i32) -> (i32, i32, i32) {
    %c0_i32 = arith.constant 0 : i32
    %c0_i32_0 = arith.constant 0 : i32
    return %arg0, %c0_i32, %arg1 : i32, i32, i32
  }
  func.func @transform_1(%arg0: i32, %arg1: i32) -> (i32, i32) {
    %c0_i32 = arith.constant 0 : i32
    %c0_i32_0 = arith.constant 0 : i32
    %c0_i32_1 = arith.constant 0 : i32
    return %c0_i32, %c0_i32_0 : i32, i32
  }
  func.func @transform_2(%arg0: i32, %arg1: i32) -> (i32, i32) {
    %c0_i32 = arith.constant 0 : i32
    %c0_i32_0 = arith.constant 0 : i32
    %c0_i32_1 = arith.constant 0 : i32
    return %c0_i32, %c0_i32_0 : i32, i32
  }
  func.func @transform_3(%arg0: i32, %arg1: i32) -> (i32, i32) {
    %c0_i32 = arith.constant 0 : i32
    %c0_i32_0 = arith.constant 0 : i32
    %c0_i32_1 = arith.constant 0 : i32
    return %c0_i32, %c0_i32_0 : i32, i32
  }
  func.func @transform_4(%arg0: i32, %arg1: i32) -> (i32, i32) {
    %c0_i32 = arith.constant 0 : i32
    %c0_i32_0 = arith.constant 0 : i32
    %c0_i32_1 = arith.constant 0 : i32
    return %c0_i32, %c0_i32_0 : i32, i32
  }
  func.func @transform_5(%arg0: i32, %arg1: i32) -> (i32, i32) {
    %c0_i32 = arith.constant 0 : i32
    %c0_i32_0 = arith.constant 0 : i32
    return %arg0, %c0_i32 : i32, i32
  }
}

</mosaic_0001>

<bundles_post_ra>
// kernel: tpu_custom_call.1
= control target key start
LH: loop header
LB: loop body
LE: loop exit
PB: predicated region body
PF: predicated region fallthrough
CT: control target
= control target key end

     0   :  { %10 = vsyncpa [#allocation4], 0  ;;  %s493_s0 = inlined_call_operand.hbm [shape: f32[8,4,256], index: 0, kind: input, shape index: {}]   ;;  %s494_s1 = inlined_call_operand.hbm [shape: f32[4,128], index: 1, kind: input, shape index: {}]   ;;  %s495_s2 = inlined_call_operand.vmem [shape: f32[1,128], index: 2, kind: input, shape index: {}]   ;;  %s496_s3 = inlined_call_operand.hbm [shape: f32[128,128], index: 3, kind: input, shape index: {}]   ;;  %s497_s4 = inlined_call_operand.vmem [shape: f32[1,128], index: 4, kind: input, shape index: {}]   ;;  %s498_s5 = inlined_call_operand.hbm [shape: f32[8,128], index: 5, kind: output, shape index: {}]  }
   0x1   :  { %11 = vsyncpa [#allocation7], 0  ;;  %s31_s20 = sshll.u32 %s494_s1, 4  ;;  %s32_s20 = int_to_ptr.hbm [resolvable:$true] %s31_s20 }
   0x2   :  { %12 = vsyncpa [#allocation5], 0  ;;  %s418_s21 = smov [#allocation6]   ;;  %s17_s25 = sshll.u32 %s493_s0, 4  ;;  %s18_s25 = int_to_ptr.hbm [resolvable:$true] %s17_s25 }
   0x3   :  { %s33_s22 = sshll.u32 %s418_s21, 4  ;;  %s419_s26 = smov [#allocation3]   ;;  %s34_s22 = int_to_ptr.vmem [resolvable:$true] %s33_s22 }
   0x4   :  { %36 = dma.hbm_to_vmem [thread:$0]  %s32_s20, 64, %s34_s22, [#allocation7]  }
   0x5   :  { %s19_s27 = sshll.u32 %s419_s26, 4  ;;  %s420_s28 = smov 128   ;;  %s20_s27 = int_to_ptr.vmem [resolvable:$true] %s19_s27 }
   0x6   :  { %s421_s29 = smov 8   ;;  %s43_s1 = sshll.u32 %s496_s3, 4  ;;  %s44_s1 = int_to_ptr.hbm [resolvable:$true] %s43_s1 }
   0x7   :  { %25 = dma.hbm_to_vmem [thread:$0]  %s18_s25, 1024, %s20_s27, [#allocation4], %s420_s28, %s420_s28, %s421_s29  }
   0x8   :  { %s422_s7 = smov [#allocation8]  }
   0x9   :  { %s45_s8 = sshll.u32 %s422_s7, 4  ;;  %s46_s8 = int_to_ptr.vmem [resolvable:$true] %s45_s8 }
   0xa   :  { %51 = dma.hbm_to_vmem [thread:$0]  %s44_s1, 2048, %s46_s8, [#allocation7], %s420_s28, %s420_s28, %s421_s29  }
   0xb   :  { %412 = dma.done.wait [#allocation4], 1024  }
   0xc   :  { %413 = vsyncadd [#allocation4], 4294966272 }
   0xd   :  { %414 = dma.done.wait [#allocation7], 2112  }
   0xe   :  { %415 = vsyncadd [#allocation7], 4294965184  ;;  %v73_v0 = vld [vmem:[#allocation3] sm:$0xff]  ;;  %v75_v1 = vld [vmem:[#allocation3 + $0x10] sm:$0xff]  ;;  %vm132_vm0 = vcmask 1043456   ;;  %vm70_vm1 = vcmask 31744   ;;  %v181_v51 = vlaneseq }
   0xf   :  { %89 = vst [vmem:[#allocation1] ss:$2 sm:$0xff] %v73_v0  ;;  %v74_v2 = vld [vmem:[#allocation3 + $0x8] sm:$0xff]  ;;  %v76_v3 = vld [vmem:[#allocation3 + $0x18] sm:$0xff]  ;;  %v77_v4 = vld [vmem:[#allocation3 + $0x20] sm:$0xff]  ;;  %v423_v48 = vmov 0.0  }
  0x10   :  { %97 = vst [vmem:[#allocation1 + $0x20] ss:$2 sm:$0xff] %v75_v1  ;;  %v79_v5 = vld [vmem:[#allocation3 + $0x30] sm:$0xff]  ;;  %v78_v10 = vld [vmem:[#allocation3 + $0x28] sm:$0xff]  ;;  %v80_v16 = vld [vmem:[#allocation3 + $0x38] sm:$0xff]  ;;  %v182_v56 = vand.u32 127, %v181_v51 }
  0x11   :  { %93 = vst [vmem:[#allocation1 + $0x10] ss:$2 sm:$0xff] %v74_v2  ;;  %v214_v49 = vld [vmem:[#allocation6] sm:$0xf]  ;;  %v260_v54 = vld [vmem:[#allocation8 + $0x70] sm:$0xff]  ;;  %v259_v55 = vld [vmem:[#allocation8 + $0x68] sm:$0xff] }
  0x12   :  { %101 = vst [vmem:[#allocation1 + $0x30] ss:$2 sm:$0xff] %v76_v3  ;;  %305 = vmatpush.msk.msra.mxu0 %vm132_vm0, %v214_v49  ;;  %v261_v53 = vld [vmem:[#allocation8 + $0x78] sm:$0xff]  ;;  %v258_v57 = vld [vmem:[#allocation8 + $0x60] sm:$0xff]  ;;  %vm191_vm2 = vcmask 1041409   ;;  %vm193_vm3 = vcmask 1042434  }
  0x13   :  { %71 = vst.msk [vmem:[#allocation2] sm:$0xff] %vm70_vm1, %v423_v48  ;;  %266 = vmatpush.msra.mxu1 %v261_v53  ;;  %v257_v60 = vld [vmem:[#allocation8 + $0x58] sm:$0xff]  ;;  %v256_v1 = vld [vmem:[#allocation8 + $0x50] sm:$0xff]  ;;  %vm195_vm4 = vcmask 1043459   ;;  %vm197_vm5 = vcmask 1044484   ;;  %vm199_vm6 = vcmask 1045509  }
  0x14   :  { %vm201_vm7 = vcmask 1046534   ;;  %vm203_vm8 = vcmask 1047559   ;;  %s424_s11 = smov [#allocation9]   ;;  %s294_s15 = sshll.u32 %s498_s5, 4  ;;  %s295_s15 = int_to_ptr.hbm [resolvable:$true] %s294_s15 }
  0x15   :  { %267 = vmatpush.msra.mxu1 %v260_v54  ;;  %s292_s12 = sshll.u32 %s424_s11, 4  ;;  %s293_s12 = int_to_ptr.vmem [resolvable:$true] %s292_s12 }
  0x16   :  { %v90_v6 = vld.sshfl [vmem:[#allocation1] sm:$0xff pattern:$0x75316420]  ;;  %v91_v7 = vld.sshfl [vmem:[#allocation1 + $0x8] sm:$0xff pattern:$0x75316420] }
  0x17   :  { %v133_v8 = vsel %vm132_vm0, %v90_v6, 0.0  ;;  %v134_v9 = vsel %vm132_vm0, %v91_v7, 0.0  ;;  %104 = vst [vmem:[#allocation1] ss:$2 sm:$0xff] %v77_v4  ;;  %268 = vmatpush.msra.mxu1 %v259_v55  ;;  %v254_v6 = vld [vmem:[#allocation8 + $0x40] sm:$0xff] }
  0x18   :  { %v135_v11 = vadd.f32 %v134_v9, %v133_v8  ;;  %v98_v12 = vld.sshfl [vmem:[#allocation1 + $0x20] sm:$0xff pattern:$0x75316420]  ;;  %v99_v13 = vld.sshfl [vmem:[#allocation1 + $0x28] sm:$0xff pattern:$0x75316420] }
  0x19   :  { %v143_v14 = vsel %vm132_vm0, %v98_v12, 0.0  ;;  %v144_v15 = vsel %vm132_vm0, %v99_v13, 0.0  ;;  %110 = vst [vmem:[#allocation1 + $0x20] ss:$2 sm:$0xff] %v79_v5  ;;  %269 = vmatpush.msra.mxu1 %v258_v57  ;;  %v255_v5 = vld [vmem:[#allocation8 + $0x48] sm:$0xff] }
  0x1a   :  { %136 = vadd.xlane.f32.xlu0 %v135_v11  ;;  %v145_v17 = vadd.f32 %v144_v15, %v143_v14  ;;  %v94_v18 = vld.sshfl [vmem:[#allocation1 + $0x10] sm:$0xff pattern:$0x75316420]  ;;  %v95_v19 = vld.sshfl [vmem:[#allocation1 + $0x18] sm:$0xff pattern:$0x75316420] }
  0x1b   :  { %107 = vst [vmem:[#allocation1 + $0x10] ss:$2 sm:$0xff] %v78_v10  ;;  %v138_v20 = vsel %vm132_vm0, %v94_v18, 0.0  ;;  %v139_v21 = vsel %vm132_vm0, %v95_v19, 0.0  ;;  %270 = vmatpush.msra.mxu1 %v257_v60  ;;  %v253_v11 = vld [vmem:[#allocation8 + $0x38] sm:$0xff] }
  0x1c   :  { %146 = vadd.xlane.f32.xlu1 %v145_v17  ;;  %v102_v22 = vld.sshfl [vmem:[#allocation1 + $0x30] sm:$0xff pattern:$0x75316420]  ;;  %v103_v23 = vld.sshfl [vmem:[#allocation1 + $0x38] sm:$0xff pattern:$0x75316420]  ;;  %v140_v26 = vadd.f32 %v139_v21, %v138_v20 }
  0x1d   :  { %113 = vst [vmem:[#allocation1 + $0x30] ss:$2 sm:$0xff] %v80_v16  ;;  %v148_v24 = vsel %vm132_vm0, %v102_v22, 0.0  ;;  %v149_v25 = vsel %vm132_vm0, %v103_v23, 0.0  ;;  %271 = vmatpush.msra.mxu1 %v256_v1  ;;  %v252_v16 = vld [vmem:[#allocation8 + $0x30] sm:$0xff]  ;;  %v251_v21 = vld [vmem:[#allocation8 + $0x28] sm:$0xff] }
  0x1e   :  { %v105_v27 = vld.sshfl [vmem:[#allocation1] sm:$0xff pattern:$0x75316420]  ;;  %v106_v28 = vld.sshfl [vmem:[#allocation1 + $0x8] sm:$0xff pattern:$0x75316420]  ;;  %v150_v32 = vadd.f32 %v149_v25, %v148_v24 }
  0x1f   :  { %v153_v29 = vsel %vm132_vm0, %v105_v27, 0.0  ;;  %v154_v30 = vsel %vm132_vm0, %v106_v28, 0.0  ;;  %272 = vmatpush.msra.mxu1 %v255_v5  ;;  %v72_v19 = vld [vmem:[#allocation2] sm:$0xff]  ;;  %v250_v24 = vld [vmem:[#allocation8 + $0x20] sm:$0xff] }
  0x20   :  { %v155_v31 = vadd.f32 %v154_v30, %v153_v29  ;;  %v111_v33 = vld.sshfl [vmem:[#allocation1 + $0x20] sm:$0xff pattern:$0x75316420]  ;;  %v112_v34 = vld.sshfl [vmem:[#allocation1 + $0x28] sm:$0xff pattern:$0x75316420] }
  0x21   :  { %v163_v39 = vsel %vm132_vm0, %v111_v33, 0.0  ;;  %v164_v40 = vsel %vm132_vm0, %v112_v34, 0.0  ;;  %273 = vmatpush.msra.mxu1 %v254_v6  ;;  %v249_v25 = vld [vmem:[#allocation8 + $0x18] sm:$0xff]  ;;  %v248_v28 = vld [vmem:[#allocation8 + $0x10] sm:$0xff]  ;;  %v247_v29 = vld [vmem:[#allocation8 + $0x8] sm:$0xff] }
  0x22   :  { %141 = vadd.xlane.f32.xlu0 %v140_v26  ;;  %156 = vadd.xlane.f32.xlu2 %v155_v31  ;;  %v108_v35 = vld.sshfl [vmem:[#allocation1 + $0x10] sm:$0xff pattern:$0x75316420]  ;;  %v109_v36 = vld.sshfl [vmem:[#allocation1 + $0x18] sm:$0xff pattern:$0x75316420]  ;;  %v165_v46 = vadd.f32 %v164_v40, %v163_v39 }
  0x23   :  { %v158_v37 = vsel %vm132_vm0, %v108_v35, 0.0  ;;  %v159_v38 = vsel %vm132_vm0, %v109_v36, 0.0  ;;  %274 = vmatpush.msra.mxu1 %v253_v11  ;;  %v246_v30 = vld [vmem:[#allocation8] sm:$0xff]  ;;  %v314_v31 = vld [vmem:[%s495_s2] ss:$0 sm:$0xff] }
  0x24   :  { %151 = vadd.xlane.f32.xlu1 %v150_v32  ;;  %v114_v41 = vld.sshfl [vmem:[#allocation1 + $0x30] sm:$0xff pattern:$0x75316420]  ;;  %v115_v42 = vld.sshfl [vmem:[#allocation1 + $0x38] sm:$0xff pattern:$0x75316420]  ;;  %v160_v45 = vadd.f32 %v159_v38, %v158_v37 }
  0x25   :  { %v168_v43 = vsel %vm132_vm0, %v114_v41, 0.0  ;;  %v169_v44 = vsel %vm132_vm0, %v115_v42, 0.0  ;;  %275 = vmatpush.msra.mxu1 %v252_v16  ;;  %v315_v35 = vld [vmem:[%s497_s4] ss:$0 sm:$0xff] }
  0x26   :  { %v170_v47 = vadd.f32 %v169_v44, %v168_v43 }
  0x27   :  { %276 = vmatpush.msra.mxu1 %v251_v21 }
  0x29   :  { %277 = vmatpush.msra.mxu1 %v250_v24 }
  0x2a   :  { %161 = vadd.xlane.f32.xlu2 %v160_v45  ;;  %166 = vadd.xlane.f32.xlu0 %v165_v46 }
  0x2b   :  { %278 = vmatpush.msra.mxu1 %v249_v25 }
  0x2c   :  { %171 = vadd.xlane.f32.xlu1 %v170_v47 }
  0x2d   :  { %279 = vmatpush.msra.mxu1 %v248_v28 }
  0x2f   :  { %280 = vmatpush.msra.mxu1 %v247_v29 }
  0x31   :  { %281 = vmatpush.msra.mxu1 %v246_v30 }
  0x8d   :  { %v137_v50 = vpop.xlane.xlu0 %136 }
  0x8e   :  { %v183_v61 = vperm.slane %v137_v50, %v182_v56 }
  0x8f   :  { %v147_v52 = vpop.xlane.xlu1 %146 }
  0x90   :  { %v185_v63 = vperm.slane %v147_v52, %v182_v56 }
  0x95   :  { %v142_v58 = vpop.xlane.xlu0 %141  ;;  %v157_v59 = vpop.xlane.xlu2 %156 }
  0x96   :  { %v184_v62 = vperm.slane %v142_v58, %v182_v56  ;;  %v187_v8 = vperm.slane %v157_v59, %v182_v56 }
  0x97   :  { %v152_v0 = vpop.xlane.xlu1 %151 }
  0x98   :  { %v192_v2 = vsel %vm191_vm2, %v184_v62, %v183_v61  ;;  %v186_v3 = vperm.slane %v152_v0, %v182_v56 }
  0x99   :  { %v194_v4 = vsel %vm193_vm3, %v185_v63, %v192_v2 }
  0x9a   :  { %v196_v7 = vsel %vm195_vm4, %v186_v3, %v194_v4 }
  0x9b   :  { %v198_v14 = vsel %vm197_vm5, %v187_v8, %v196_v7 }
  0x9d   :  { %v162_v9 = vpop.xlane.xlu2 %161  ;;  %v167_v10 = vpop.xlane.xlu0 %166 }
  0x9e   :  { %v188_v12 = vperm.slane %v162_v9, %v182_v56  ;;  %v189_v13 = vperm.slane %v167_v10, %v182_v56 }
  0x9f   :  { %v172_v15 = vpop.xlane.xlu1 %171 }
  0xa0   :  { %v200_v17 = vsel %vm199_vm6, %v188_v12, %v198_v14  ;;  %v190_v18 = vperm.slane %v172_v15, %v182_v56 }
  0xa1   :  { %v202_v20 = vsel %vm201_vm7, %v189_v13, %v200_v17 }
  0xa2   :  { %v204_v22 = vsel %vm203_vm8, %v190_v18, %v202_v20 }
  0xa3   :  { %v206_v23 = vadd.f32 %v204_v22, %v72_v19 }
  0xa5   :  { %208 = vst.msk [vmem:[#allocation2] sm:$0xff] %vm70_vm1, %v206_v23 }
  0xac   :  { %v212_v26 = vld [vmem:[#allocation2] sm:$0xff] }
  0xad   :  { %v213_v27 = vmul.f32 0.00390625, %v212_v26 }
  0xaf   :  { %306 = vmatmul.msk.f32.vlgmr.msra.gmra.mxu0 %vm70_vm1, %v213_v27 }
 0x12c   :  { %v242_v32 = vpop.f32.mrf.mxu0 }
 0x12d   :  { %v243_v33 = vadd.f32 %v314_v31, %v242_v32 }
 0x12f   :  { %v245_v34 = vmax.f32 %v243_v33, 0.0 }
 0x131   :  { %282 = vmatmul.f32.vlgmr.msra.gmra.mxu1 %v245_v34 }
 0x1ae   :  { %v283_v36 = vpop.f32.mrf.mxu1 }
 0x1af   :  { %v284_v37 = vadd.f32 %v315_v35, %v283_v36 }
 0x1b1   :  { %286 = vst [vmem:[#allocation9] sm:$0xff] %v284_v37 }
 0x1b2   :  { %297 = dma.vmem_to_hbm [thread:$0]  %s293_s12, 128, %s295_s15, [#allocation5]  }
 0x1b3   :  { %416 = dma.done.wait [#allocation5], 128  }
 0x1b4   :  { %417 = vsyncadd [#allocation5], 4294967168 }
 0x1b5   :  { %302 = vsyncpa [#allocation4], 1 }
 0x1b6   :  { %303 = vsyncpa [#allocation7], 1 }
 0x1b7   :  { %304 = vsyncpa [#allocation5], 1 }

</bundles_post_ra>
